<compile_context>
chip_gen: v7x
topology: tpu7x:2x2x1
jax: 0.10.0
libtpu: 0.0.40
codegen_flags: <defaults>
</compile_context>

<pallas_src>
import jax
import jax.numpy as jnp
from jax.experimental import pallas as pl
from jax.experimental.pallas import tpu as pltpu


# ------------------------------ Pallas kernel --------------------------------

def fused_head_kernel(emb_ref, mask_ref, ment_ref, subm_ref,
                      w_enc_ref, b_enc_ref, w_all_ref, b_all_ref,
                      objmask_ref, out_ref):
    """One grid step == one batch element (grid=(B,), 'parallel' axis)."""
    # TODO(synk): the pretrained BertModel forward (12-layer transformer,
    # resized token embeddings) has no in-script equivalent; replaced by a
    # deterministic masked linear+tanh encoder with identical output shape.
    S = ment_ref.shape[1]
    cdt = w_enc_ref.dtype            # MXU operand dtype (bf16 on the perf path)

    # ---- shared encoder: ONE (S+Sm, D)@(D, D) MXU pass covers both the text
    #      and marker rows of this batch; results never leave VMEM.
    h = jnp.dot(emb_ref[0], w_enc_ref[...],
                preferred_element_type=jnp.float32) + b_enc_ref[...]
    all_enc = jnp.tanh(h) * mask_ref[0]                      # (S+Sm, D) f32 VPU

    enc = all_enc[:S, :]                                     # encoded_text
    menc = all_enc[S:, :]                                    # marker_encoded_text

    # ---- encoded_type_text = encoded_text + marker_entity @ marker_encoded
    etype = enc + jnp.dot(ment_ref[0], menc.astype(cdt),
                          preferred_element_type=jnp.float32)        # (S, D)

    # ---- all four heads as ONE lane-dense (S, D)@(D, HP) matmul
    #      (columns: [sub_head | sub_tail | obj_heads(R) | obj_tails(R) | pad],
    #      biases folded into b_all).
    logits = jnp.dot(etype.astype(cdt), w_all_ref[...],
                     preferred_element_type=jnp.float32)             # (S, HP)

    # ---- subject-conditioned object logits.  With subm = (sub_head+sub_tail)/2:
    #        sub = subm @ etype  and  sub @ W == subm @ (etype @ W) == subm @ logits,
    #      so the separate (1, D)@(D, HP) MXU launch folds into a tiny
    #      (1, S)@(S, HP) reuse of `logits`.  Gated onto obj columns only.
    sub_logits = jnp.dot(subm_ref[0], logits.astype(cdt),
                         preferred_element_type=jnp.float32)         # (1, HP)

    out_ref[0] = jax.nn.sigmoid(
        logits + b_all_ref[...] + objmask_ref[...] * sub_logits)


# -------------------------------- wrapper -------------------------------------

def cnn_forward(token_ids, mask, sub_head, sub_tail,
                marker_token_ids, marker_masks, marker_entity, params,
                *, compute_dtype=jnp.bfloat16):
    B, S = token_ids.shape
    Sm = marker_token_ids.shape[1]
    D = params["emb_table"].shape[1]
    R = params["w_oh"].shape[1]
    f32 = jnp.float32

    # The in-kernel split of the stacked encoder output at row S must land on
    # a sublane (8) boundary; pad sequences in the caller if needed.
    assert S % 8 == 0 and Sm % 8 == 0, "pad S and Sm to multiples of 8"
    # Packed head width rounded up to full 128-lane groups (no truncation
    # when num_relations > 63).
    HP = max(128, -(-(2 + 2 * R) // 128) * 128)

    # Embedding lookup kept in the wrapper (glue).
    # TODO(synk): at BERT scale, move this gather into the kernel
    # (scalar-prefetch token_ids into SMEM + manual emb_table row DMA from a
    # pl.ANY ref) to remove the (B, S+Sm, D) HBM round-trip of all_emb.
    emb = jnp.take(params["emb_table"], token_ids, axis=0)           # (B, S, D)
    memb = jnp.take(params["emb_table"], marker_token_ids, axis=0)   # (B, Sm, D)
    all_emb = jnp.concatenate([emb, memb], axis=1).astype(compute_dtype)
    all_mask = jnp.concatenate([mask, marker_masks],
                               axis=1)[..., None].astype(f32)        # (B, S+Sm, 1)

    # Combined subject mapping: sub = 0.5*(sub_head + sub_tail) applied to etype.
    subm = (0.5 * (sub_head + sub_tail))[:, None, :].astype(compute_dtype)

    # Pack the four head projections into one lane-dense (D, HP) weight with
    # all biases folded into one (1, HP) vector.
    w_all = jnp.zeros((D, HP), f32)
    w_all = w_all.at[:, 0:1].set(params["w_sh"])
    w_all = w_all.at[:, 1:2].set(params["w_st"])
    w_all = w_all.at[:, 2:2 + R].set(params["w_oh"])
    w_all = w_all.at[:, 2 + R:2 + 2 * R].set(params["w_ot"])
    b_all = jnp.zeros((1, HP), f32)
    b_all = b_all.at[:, 0:1].set(params["b_sh"])
    b_all = b_all.at[:, 1:2].set(params["b_st"])
    b_all = b_all.at[:, 2:2 + R].set(params["b_oh"])
    b_all = b_all.at[:, 2 + R:2 + 2 * R].set(params["b_ot"])
    obj_mask = jnp.zeros((1, HP), f32).at[:, 2:2 + 2 * R].set(1.0)

    Lp = S + Sm
    packed = pl.pallas_call(
        fused_head_kernel,
        out_shape=jax.ShapeDtypeStruct((B, S, HP), f32),
        # Batch-tiled grid: per-step working set is a few MB at BERT scale
        # (fits default scoped VMEM on all generations), inputs of step i+1
        # are double-buffered behind compute of step i, and the 'parallel'
        # axis lets v7x shard steps across its two TensorCores.
        grid=(B,),
        in_specs=[
            pl.BlockSpec((1, Lp, D), lambda b: (b, 0, 0)),   # stacked embeddings
            pl.BlockSpec((1, Lp, 1), lambda b: (b, 0, 0)),   # stacked masks
            pl.BlockSpec((1, S, Sm), lambda b: (b, 0, 0)),   # marker_entity
            pl.BlockSpec((1, 1, S), lambda b: (b, 0, 0)),    # combined sub map
            pl.BlockSpec((D, D), lambda b: (0, 0)),          # w_enc   (resident)
            pl.BlockSpec((1, D), lambda b: (0, 0)),          # b_enc   (resident)
            pl.BlockSpec((D, HP), lambda b: (0, 0)),         # packed head weights
            pl.BlockSpec((1, HP), lambda b: (0, 0)),         # packed head biases
            pl.BlockSpec((1, HP), lambda b: (0, 0)),         # obj-column mask
        ],
        out_specs=pl.BlockSpec((1, S, HP), lambda b: (b, 0, 0)),
        compiler_params=pltpu.CompilerParams(
            dimension_semantics=("parallel",)),
    )(all_emb, all_mask, marker_entity.astype(compute_dtype), subm,
      params["w_enc"].astype(compute_dtype), params["b_enc"].astype(f32),
      w_all.astype(compute_dtype), b_all, obj_mask)

    return {
        "sub_heads": packed[:, :, 0:1],
        "sub_tails": packed[:, :, 1:2],
        "obj_heads": packed[:, :, 2:2 + R],
        "obj_tails": packed[:, :, 2 + R:2 + 2 * R],
    }


# ------------------------------- reference ------------------------------------

def ref_forward(token_ids, mask, sub_head, sub_tail,
                marker_token_ids, marker_masks, marker_entity, params):
    with jax.default_matmul_precision("highest"):
        def enc(ids, m):
            e = jnp.take(params["emb_table"], ids, axis=0)
            return jnp.tanh(e @ params["w_enc"] + params["b_enc"]) * m[..., None]

        encoded_text = enc(token_ids, mask.astype(jnp.float32))
        marker_encoded_text = enc(marker_token_ids, marker_masks.astype(jnp.float32))

        marker_proj = jnp.einsum("bsm,bmd->bsd", marker_entity, marker_encoded_text)
        etype = encoded_text + marker_proj

        sub_heads = jax.nn.sigmoid(etype @ params["w_sh"] + params["b_sh"])
        sub_tails = jax.nn.sigmoid(etype @ params["w_st"] + params["b_st"])

        shm = sub_head[:, None, :]
        stm = sub_tail[:, None, :]
        sh = jnp.einsum("bos,bsd->bod", shm, etype)
        st = jnp.einsum("bos,bsd->bod", stm, etype)
        sub = (sh + st) / 2.0
        enc2 = etype + sub
        obj_heads = jax.nn.sigmoid(enc2 @ params["w_oh"] + params["b_oh"])
        obj_tails = jax.nn.sigmoid(enc2 @ params["w_ot"] + params["b_ot"])
    return {"sub_heads": sub_heads, "sub_tails": sub_tails,
            "obj_heads": obj_heads, "obj_tails": obj_tails}


# ---------------------------------- main ---------------------------------------

if __name__ == "__main__":
    B, S, Sm, D, R, VOCAB = 2, 16, 8, 32, 4, 64

    key = jax.random.PRNGKey(0)
    ks = jax.random.split(key, 16)

    params = {
        "emb_table": jax.random.normal(ks[0], (VOCAB, D), jnp.float32) * 0.5,
        "w_enc": jax.random.normal(ks[1], (D, D), jnp.float32) * 0.2,
        "b_enc": jax.random.normal(ks[2], (1, D), jnp.float32) * 0.1,
        "w_sh": jax.random.normal(ks[3], (D, 1), jnp.float32) * 0.3,
        "b_sh": jax.random.normal(ks[4], (1, 1), jnp.float32) * 0.1,
        "w_st": jax.random.normal(ks[5], (D, 1), jnp.float32) * 0.3,
        "b_st": jax.random.normal(ks[6], (1, 1), jnp.float32) * 0.1,
        "w_oh": jax.random.normal(ks[7], (D, R), jnp.float32) * 0.3,
        "b_oh": jax.random.normal(ks[8], (1, R), jnp.float32) * 0.1,
        "w_ot": jax.random.normal(ks[9], (D, R), jnp.float32) * 0.3,
        "b_ot": jax.random.normal(ks[10], (1, R), jnp.float32) * 0.1,
    }

    token_ids = jax.random.randint(ks[11], (B, S), 0, VOCAB)
    mask = jnp.ones((B, S), jnp.float32)
    marker_token_ids = jax.random.randint(ks[12], (B, Sm), 0, VOCAB)
    marker_masks = jnp.ones((B, Sm), jnp.float32)
    # attention-like marker weights (rows sum to 1, as a marker selector would)
    me = jax.random.uniform(ks[13], (B, S, Sm), jnp.float32)
    marker_entity = me / me.sum(-1, keepdims=True)
    # one-hot subject head / tail positions (CASREL-style training)
    sub_head = jax.nn.one_hot(jnp.array([2, 5]), S, dtype=jnp.float32)
    sub_tail = jax.nn.one_hot(jnp.array([4, 7]), S, dtype=jnp.float32)

    args = (token_ids, mask, sub_head, sub_tail,
            marker_token_ids, marker_masks, marker_entity, params)
    ref = ref_forward(*args)
    names = ("sub_heads", "sub_tails", "obj_heads", "obj_tails")

    # 1) structural check: f32 MXU operands, tight tolerance.
    out_f32 = jax.block_until_ready(cnn_forward(*args, compute_dtype=jnp.float32))
    for k in names:
        assert out_f32[k].shape == ref[k].shape, (k, out_f32[k].shape, ref[k].shape)
        assert jnp.allclose(out_f32[k], ref[k], atol=2e-3, rtol=2e-3), k

    # 2) default perf path: bf16 MXU operands / f32 accumulation (per review);
    #    looser tolerance for sigmoid probabilities vs. the f32 reference.
    out = jax.block_until_ready(cnn_forward(*args))
    for k in names:
        assert out[k].shape == ref[k].shape, (k, out[k].shape, ref[k].shape)
        assert jnp.allclose(out[k], ref[k], atol=5e-2, rtol=5e-2), k

    print("KERNEL_OK")
</pallas_src>

<mosaic_0001>
module attributes {stable_mosaic.version = 11 : i64} {
  func.func @fused_head_kernel(%arg0: i32, %arg1: memref<1x24x32xf32, #tpu.memory_space<vmem>>, %arg2: memref<1x24x1xf32, #tpu.memory_space<vmem>>, %arg3: memref<1x16x8xf32, #tpu.memory_space<vmem>>, %arg4: memref<1x1x16xf32, #tpu.memory_space<vmem>>, %arg5: memref<32x32xf32, #tpu.memory_space<vmem>>, %arg6: memref<1x32xf32, #tpu.memory_space<vmem>>, %arg7: memref<32x128xf32, #tpu.memory_space<vmem>>, %arg8: memref<1x128xf32, #tpu.memory_space<vmem>>, %arg9: memref<1x128xf32, #tpu.memory_space<vmem>>, %arg10: memref<1x16x128xf32, #tpu.memory_space<vmem>>) attributes {dimension_semantics = [#tpu.dimension_semantics<parallel>], iteration_bounds = array<i64: 2>, scalar_prefetch = 0 : i64, scratch_operands = 0 : i64, tpu.core_type = #tpu.core_type<tc>, window_params = [{transform_indices = @transform_0, window_bounds = array<i64: 1, 24, 32>}, {transform_indices = @transform_1, window_bounds = array<i64: 1, 24, 1>}, {transform_indices = @transform_2, window_bounds = array<i64: 1, 16, 8>}, {transform_indices = @transform_3, window_bounds = array<i64: 1, 1, 16>}, {pipeline_mode = #tpu.pipeline_mode<synchronous>, transform_indices = @transform_4, window_bounds = array<i64: 32, 32>}, {pipeline_mode = #tpu.pipeline_mode<synchronous>, transform_indices = @transform_5, window_bounds = array<i64: 1, 32>}, {pipeline_mode = #tpu.pipeline_mode<synchronous>, transform_indices = @transform_6, window_bounds = array<i64: 32, 128>}, {pipeline_mode = #tpu.pipeline_mode<synchronous>, transform_indices = @transform_7, window_bounds = array<i64: 1, 128>}, {pipeline_mode = #tpu.pipeline_mode<synchronous>, transform_indices = @transform_8, window_bounds = array<i64: 1, 128>}, {transform_indices = @transform_9, window_bounds = array<i64: 1, 16, 128>}]} {
    %c0 = arith.constant 0 : index
    %c0_0 = arith.constant 0 : index
    %c0_1 = arith.constant 0 : index
    %0 = vector.load %arg1[%c0, %c0_0, %c0_1] : memref<1x24x32xf32, #tpu.memory_space<vmem>>, vector<1x24x32xf32>
    %1 = vector.shape_cast %0 : vector<1x24x32xf32> to vector<24x32xf32>
    %c0_2 = arith.constant 0 : index
    %c0_3 = arith.constant 0 : index
    %2 = vector.load %arg5[%c0_2, %c0_3] : memref<32x32xf32, #tpu.memory_space<vmem>>, vector<32x32xf32>
    %cst = arith.constant dense<0.000000e+00> : vector<24x32xf32>
    %3 = tpu.matmul %1, %2, %cst {dimension_numbers = #tpu.dot_dimension_numbers<[1], [0], [0], [1], [0, 0, 1, 1], [], []>} : vector<24x32xf32>, vector<32x32xf32>, vector<24x32xf32> -> vector<24x32xf32>
    %c0_4 = arith.constant 0 : index
    %c0_5 = arith.constant 0 : index
    %4 = vector.load %arg6[%c0_4, %c0_5] : memref<1x32xf32, #tpu.memory_space<vmem>>, vector<1x32xf32>
    %5 = vector.broadcast %4 : vector<1x32xf32> to vector<24x32xf32>
    %6 = arith.addf %3, %5 : vector<24x32xf32>
    %7 = math.tanh %6 : vector<24x32xf32>
    %c0_6 = arith.constant 0 : index
    %c0_7 = arith.constant 0 : index
    %c0_8 = arith.constant 0 : index
    %8 = vector.load %arg2[%c0_6, %c0_7, %c0_8] : memref<1x24x1xf32, #tpu.memory_space<vmem>>, vector<1x24x1xf32>
    %9 = vector.shape_cast %8 : vector<1x24x1xf32> to vector<24x1xf32>
    %10 = vector.broadcast %9 : vector<24x1xf32> to vector<24x32xf32>
    %11 = arith.mulf %7, %10 : vector<24x32xf32>
    %12 = vector.extract_strided_slice %11 {offsets = [0, 0], sizes = [16, 32], strides = [1, 1]} : vector<24x32xf32> to vector<16x32xf32>
    %13 = vector.extract_strided_slice %11 {offsets = [16, 0], sizes = [8, 32], strides = [1, 1]} : vector<24x32xf32> to vector<8x32xf32>
    %c0_9 = arith.constant 0 : index
    %c0_10 = arith.constant 0 : index
    %c0_11 = arith.constant 0 : index
    %14 = vector.load %arg3[%c0_9, %c0_10, %c0_11] : memref<1x16x8xf32, #tpu.memory_space<vmem>>, vector<1x16x8xf32>
    %15 = vector.shape_cast %14 : vector<1x16x8xf32> to vector<16x8xf32>
    %cst_12 = arith.constant dense<0.000000e+00> : vector<16x32xf32>
    %16 = tpu.matmul %15, %13, %cst_12 {dimension_numbers = #tpu.dot_dimension_numbers<[1], [0], [0], [1], [0, 0, 1, 1], [], []>} : vector<16x8xf32>, vector<8x32xf32>, vector<16x32xf32> -> vector<16x32xf32>
    %17 = arith.addf %12, %16 : vector<16x32xf32>
    %c0_13 = arith.constant 0 : index
    %c0_14 = arith.constant 0 : index
    %18 = vector.load %arg7[%c0_13, %c0_14] : memref<32x128xf32, #tpu.memory_space<vmem>>, vector<32x128xf32>
    %cst_15 = arith.constant dense<0.000000e+00> : vector<16x128xf32>
    %19 = tpu.matmul %17, %18, %cst_15 {dimension_numbers = #tpu.dot_dimension_numbers<[1], [0], [0], [1], [0, 0, 1, 1], [], []>} : vector<16x32xf32>, vector<32x128xf32>, vector<16x128xf32> -> vector<16x128xf32>
    %c0_16 = arith.constant 0 : index
    %c0_17 = arith.constant 0 : index
    %c0_18 = arith.constant 0 : index
    %20 = vector.load %arg4[%c0_16, %c0_17, %c0_18] : memref<1x1x16xf32, #tpu.memory_space<vmem>>, vector<1x1x16xf32>
    %21 = vector.shape_cast %20 : vector<1x1x16xf32> to vector<1x16xf32>
    %cst_19 = arith.constant dense<0.000000e+00> : vector<1x128xf32>
    %22 = tpu.matmul %21, %19, %cst_19 {dimension_numbers = #tpu.dot_dimension_numbers<[1], [0], [0], [1], [0, 0, 1, 1], [], []>} : vector<1x16xf32>, vector<16x128xf32>, vector<1x128xf32> -> vector<1x128xf32>
    %c0_20 = arith.constant 0 : index
    %c0_21 = arith.constant 0 : index
    %23 = vector.load %arg8[%c0_20, %c0_21] : memref<1x128xf32, #tpu.memory_space<vmem>>, vector<1x128xf32>
    %24 = vector.broadcast %23 : vector<1x128xf32> to vector<16x128xf32>
    %25 = arith.addf %19, %24 : vector<16x128xf32>
    %c0_22 = arith.constant 0 : index
    %c0_23 = arith.constant 0 : index
    %26 = vector.load %arg9[%c0_22, %c0_23] : memref<1x128xf32, #tpu.memory_space<vmem>>, vector<1x128xf32>
    %27 = arith.mulf %26, %22 : vector<1x128xf32>
    %28 = vector.broadcast %27 : vector<1x128xf32> to vector<16x128xf32>
    %29 = arith.addf %25, %28 : vector<16x128xf32>
    %30 = arith.negf %29 : vector<16x128xf32>
    %31 = math.exp %30 : vector<16x128xf32>
    %cst_24 = arith.constant 1.000000e+00 : f32
    %32 = vector.broadcast %cst_24 : f32 to vector<16x128xf32>
    %33 = arith.addf %32, %31 : vector<16x128xf32>
    %34 = arith.divf %32, %33 : vector<16x128xf32>
    %c0_25 = arith.constant 0 : index
    %c0_26 = arith.constant 0 : index
    %c0_27 = arith.constant 0 : index
    %35 = vector.load %arg10[%c0_25, %c0_26, %c0_27] : memref<1x16x128xf32, #tpu.memory_space<vmem>>, vector<1x16x128xf32>
    %36 = vector.shape_cast %35 : vector<1x16x128xf32> to vector<16x128xf32>
    %37 = vector.shape_cast %34 : vector<16x128xf32> to vector<1x16x128xf32>
    tpu.vector_store %arg10[%c0_25, %c0_26, %c0_27], %37 {strides = array<i32>} : memref<1x16x128xf32, #tpu.memory_space<vmem>>, vector<1x16x128xf32>,
    return
  }
  func.func @transform_0(%arg0: i32) -> (i32, i32, i32) {
    %c0_i32 = arith.constant 0 : i32
    %c0_i32_0 = arith.constant 0 : i32
    %c0_i32_1 = arith.constant 0 : i32
    return %arg0, %c0_i32, %c0_i32_0 : i32, i32, i32
  }
  func.func @transform_1(%arg0: i32) -> (i32, i32, i32) {
    %c0_i32 = arith.constant 0 : i32
    %c0_i32_0 = arith.constant 0 : i32
    %c0_i32_1 = arith.constant 0 : i32
    return %arg0, %c0_i32, %c0_i32_0 : i32, i32, i32
  }
  func.func @transform_2(%arg0: i32) -> (i32, i32, i32) {
    %c0_i32 = arith.constant 0 : i32
    %c0_i32_0 = arith.constant 0 : i32
    %c0_i32_1 = arith.constant 0 : i32
    return %arg0, %c0_i32, %c0_i32_0 : i32, i32, i32
  }
  func.func @transform_3(%arg0: i32) -> (i32, i32, i32) {
    %c0_i32 = arith.constant 0 : i32
    %c0_i32_0 = arith.constant 0 : i32
    %c0_i32_1 = arith.constant 0 : i32
    return %arg0, %c0_i32, %c0_i32_0 : i32, i32, i32
  }
  func.func @transform_4(%arg0: i32) -> (i32, i32) {
    %c0_i32 = arith.constant 0 : i32
    %c0_i32_0 = arith.constant 0 : i32
    %c0_i32_1 = arith.constant 0 : i32
    return %c0_i32, %c0_i32_0 : i32, i32
  }
  func.func @transform_5(%arg0: i32) -> (i32, i32) {
    %c0_i32 = arith.constant 0 : i32
    %c0_i32_0 = arith.constant 0 : i32
    %c0_i32_1 = arith.constant 0 : i32
    return %c0_i32, %c0_i32_0 : i32, i32
  }
  func.func @transform_6(%arg0: i32) -> (i32, i32) {
    %c0_i32 = arith.constant 0 : i32
    %c0_i32_0 = arith.constant 0 : i32
    %c0_i32_1 = arith.constant 0 : i32
    return %c0_i32, %c0_i32_0 : i32, i32
  }
  func.func @transform_7(%arg0: i32) -> (i32, i32) {
    %c0_i32 = arith.constant 0 : i32
    %c0_i32_0 = arith.constant 0 : i32
    %c0_i32_1 = arith.constant 0 : i32
    return %c0_i32, %c0_i32_0 : i32, i32
  }
  func.func @transform_8(%arg0: i32) -> (i32, i32) {
    %c0_i32 = arith.constant 0 : i32
    %c0_i32_0 = arith.constant 0 : i32
    %c0_i32_1 = arith.constant 0 : i32
    return %c0_i32, %c0_i32_0 : i32, i32
  }
  func.func @transform_9(%arg0: i32) -> (i32, i32, i32) {
    %c0_i32 = arith.constant 0 : i32
    %c0_i32_0 = arith.constant 0 : i32
    %c0_i32_1 = arith.constant 0 : i32
    return %arg0, %c0_i32, %c0_i32_0 : i32, i32, i32
  }
}

</mosaic_0001>

<bundles_post_ra>
// kernel: tpu_custom_call.1
= control target key start
LH: loop header
LB: loop body
LE: loop exit
PB: predicated region body
PF: predicated region fallthrough
CT: control target
= control target key end

     0   :  { %s1494_s0 = inlined_call_operand.vmem [shape: f32[2,24,32], index: 0, kind: input, shape index: {}]   ;;  %s1495_s1 = inlined_call_operand.vmem [shape: f32[2,24,1], index: 1, kind: input, shape index: {}]   ;;  %s1496_s2 = inlined_call_operand.vmem [shape: f32[2,16,8], index: 2, kind: input, shape index: {}]   ;;  %s1497_s3 = inlined_call_operand.hbm [shape: f32[2,1,16], index: 3, kind: input, shape index: {}]   ;;  %s1498_s4 = inlined_call_operand.vmem [shape: f32[32,32], index: 4, kind: input, shape index: {}]   ;;  %s1499_s5 = inlined_call_operand.vmem [shape: f32[1,32], index: 5, kind: input, shape index: {}]   ;;  %s1500_s6 = inlined_call_operand.vmem [shape: f32[32,128], index: 6, kind: input, shape index: {}]   ;;  %s1501_s7 = inlined_call_operand.vmem [shape: f32[1,128], index: 7, kind: input, shape index: {}]   ;;  %s1502_s8 = inlined_call_operand.vmem [shape: f32[1,128], index: 8, kind: input, shape index: {}]   ;;  %s1503_s9 = inlined_call_operand.hbm [shape: f32[2,16,128], index: 9, kind: output, shape index: {}]  }
   0x1   :  { %1505 = sst [smem:[#allocation9_spill]] %s1497_s3 }
   0x2   :  { %14 = vsyncpa [#allocation3], 0 }
   0x3   :  { %16 = vsyncpa [#allocation3 + $0x1], 0 }
   0x4   :  { %17 = vsyncpa [#allocation4], 0 }
   0x5   :  { %19 = vsyncpa [#allocation4 + $0x1], 0  ;;  %s1262_s30 = smov 0   ;;  %s1264_s10 = smov 0  }
   0x6   :  { %s1266_s11 = smov 0   ;;  %s1268_s12 = smov 0  }
   0x7 LB: > { %s1283_s13 = sadd.s32 4294967295, %s1202_s12   ;;  %s932_s14 = sadd.s32 4294967294, %s1202_s12   ;;  %s1202_s12 = sphi %s1268_s12, %s1523_s12   ;;  %s1198_s11 = sphi %s1266_s11, %s1522_s11   ;;  %s1194_s10 = sphi %s1264_s10, %s1521_s10   ;;  %s1190_s30 = sphi %s1262_s30, %s1520_s30  }
   0x8   : > { %s1287_s15 = sadd.s32 1, %s1202_s12   ;;  %s110_s16 = sadd.s32 1, %s1198_s11 }
   0x9   : > { %s107_s17 = ssub.s32 %s1202_s12, %s1287_s15  ;;  %p117_p0 = scmp.ne.s32.totalorder %s1198_s11, %s1194_s10 }
   0xa   : > { %p108_p1 = scmp.eq.s32.totalorder %s107_s17, 0  ;;  %p118_p2 = scmp.eq.s32.totalorder %s1202_s12, 0 }
   0xb   : > { %p123_p3 = scmp.ne.s32.totalorder %s1194_s10, %s1190_s30  ;;  %p124_p4 = scmp.eq.s32.totalorder %s1283_s13, 0 }
   0xc   : > { %s1299_s18 = scalar_select %p108_p1, %s1198_s11, %s110_s16  }
   0xd   : > { %p1301_p5 = por %p118_p2, %p117_p0  ;;  %p1305_p6 = por %p124_p4, %p123_p3 }
   0xe   : > { %1506 = sst [smem:[#allocation8_spill]] %s1299_s18  ;;  %p252_p7 = scmp.eq.s32.totalorder %s1283_s13, 1 }
   0xf   : > { %p258_p8 = scmp.eq.s32.totalorder %s932_s14, 1  ;;  %p1050_p10 = scmp.lt.s32.totalorder %s1202_s12, 2 }
  0x10   : > { %p1312_p11 = por %p252_p7, %p117_p0  ;;  %s317_s23 = sand.u32 1, %s1198_s11  }
  0x11   : > { %p1316_p12 = por %p258_p8, %p123_p3  ;;  %s935_s24 = sshll.u32 %s1202_s12, 4 }
  0x12   : > { %s1509_s21 = scalar_select %p1312_p11, 1, 0 }
  0x13   : > { %s1510_s22 = scalar_select %p1316_p12, 1, 0 }
  0x14   : > { %s1511_s3 = sld [smem:[#allocation9_spill]]  ;;  %s320_s28 = scalar_lea.vmem [#allocation2], %s317_s23 }
  0x15   : > { %s327_s29 = sshll.u32 %s320_s28, 4  ;;  %p1331_p13 = pnand %p1050_p10, %p1301_p5  ;;  %s1327_s29 = int_to_ptr.vmem [resolvable:$true] %s327_s29 }
  0x16   : > { %s318_s16 = scalar_lea.sflag [#allocation3], %s317_s23 }
  0x17   : > { %p1108_p3 = pneg %p1331_p13 }
  0x1a   : > { %s1325_s27 = scalar_lea.hbm %s1511_s3, %s935_s24  ;;  %s1111_s19 = scalar_lea.hbm %s1511_s3, 32 }
  0x1b   : > { %s1106_s17 = scalar_lea.hbm %s1325_s27, 16  ;;  %p1112_p5 = scmp.lt.u32.totalorder %s1325_s27, %s1511_s3 }
  0x1c   : > { %p1107_p2 = scmp.ne.s32.totalorder %s1325_s27, %s1106_s17  ;;  %p1113_p8 = scmp.lt.u32.totalorder %s1111_s19, %s1106_s17 }
  0x1d   : > { %p1115_p9 = scmp.lt.u32.totalorder %s1106_s17, %s1325_s27 }
  0x1e   : > { %p1109_p4 = pnand %p1108_p3, %p1107_p2  ;;  %p1114_p10 = por %p1113_p8, %p1112_p5 }
  0x20   : > { %p1110_p7 = pneg %p1109_p4  ;;  %p1116_p0 = por %p1115_p9, %p1114_p10 }
  0x22   : > { %p1117_p1 = pnand %p1116_p0, %p1110_p7 }
  0x24   : > { %1120 = shalt.err (!%p1117_p1)
}
  0x25   : > { %s1121_s23 = scalar_lea.vmem %s1327_s29, 16  ;;  %s1204_s24 = smov [#allocation2]  }
  0x26   : > { %p1122_p2 = scmp.ne.s32.totalorder %s1327_s29, %s1121_s23  ;;  %s1126_s25 = sshll.u32 %s1204_s24, 4  ;;  %s1127_s25 = int_to_ptr.vmem [resolvable:$false] %s1126_s25 }
  0x27   : > { %s1128_s26 = scalar_lea.vmem %s1127_s25, 32  ;;  %p1129_p11 = scmp.lt.s32.totalorder %s1327_s29, %s1127_s25 }
  0x28   : > { %p1124_p4 = pnand %p1122_p2, %p1108_p3  ;;  %p1130_p5 = scmp.lt.s32.totalorder %s1128_s26, %s1121_s23 }
  0x2a   : > { %p1125_p12 = pneg %p1124_p4  ;;  %p1131_p8 = por %p1130_p5, %p1129_p11 }
  0x2c   : > { %p1132_p9 = pnand %p1131_p8, %p1125_p12 }
  0x2e   : > { %1135 = shalt.err (!%p1132_p9)
}
  0x2f   : > { %1045 = dma.hbm_to_vmem [thread:$0]  (!%p1331_p13), %s1325_s27, 16, %s1327_s29, %s318_s16  }
  0x30   : > { %p1513_p0 = scmp.lt.s32.totalorder %s1202_s12, 3  ;;  %p1514_p1 = scmp.ge.s32.totalorder %s1202_s12, 1 }
  0x32   : > { %p333_p3 = pnand %p1514_p1, %p1513_p0 }
  0x33   : > { %s1367_s17 = sand.u32 (!%p333_p3), 1, %s1194_s10  }
  0x34   : > { %336 = sbr.rel (%p333_p3) target bundleno = 1003 (0x3eb), region = 56  ;;  %s339_s19 = scalar_lea.sflag (!%p333_p3), [#allocation3], %s1367_s17 }
  0x3b   : > { %1181 = dma.done.wait (%p1305_p6), %s339_s19, 16  }
  0x3c   : > { %1183 = vsyncadd (%p1305_p6), %s339_s19, 4294967280  ;;  %p390_p11 = scmp.lt.s32.totalorder %s1283_s13, 1  ;;  %v1205_v0 = vmov 0.0|0.0   ;;  %vm1206_vm0 = vmmov 0   ;;  %v1207_v1 = vmov 0.0   ;;  %v1208_v2 = vmov 0  }
  0x3d   : > { %1020 = vmatprep.subr.bf16.mxu0 %v1205_v0  ;;  %988 = vmatprep.mubr.msk.f32.mxu0 %vm1206_vm0, %v1207_v1  ;;  %v408_v3 = vld [vmem:[%s1498_s4] sm:$0xff]  ;;  %v409_v4 = vld [vmem:[%s1498_s4 + $0x8] sm:$0xff]  ;;  %v410_v5 = vld [vmem:[%s1498_s4 + $0x10] sm:$0xff]  ;;  %vm419_vm1 = vcmask 261120   ;;  %vm535_vm2 = vcmask 64512   ;;  %s1515_s18 = scalar_lea.vmem [#allocation2], %s1367_s17  ;;  %v791_v50 = vlaneseq }
  0x3e   : > { %s1380_s27 = scalar_select %p390_p11, %s1283_s13, 1  ;;  %1090 = vset.pattern.permute.xlu0 %v1208_v2  ;;  %1091 = vset.pattern.permute.xlu1 %v1208_v2  ;;  %v1021_v6 = vpack.c.bf16 %v409_v4, %v408_v3  ;;  %v411_v7 = vld [vmem:[%s1498_s4 + $0x18] sm:$0xff]  ;;  %v942_v16 = vld [vmem:[%s1499_s5] ss:$0 sm:$0xff]  ;;  %v620_v27 = vld [vmem:[%s1500_s6 + $0x8] sm:$0xff]  ;;  %vm705_vm3 = vcmask 130048  }
  0x3f   : > { %v1024_v9 = vpack.c.bf16 %v411_v7, %v410_v5  ;;  %v619_v26 = vld [vmem:[%s1500_s6] sm:$0xff]  ;;  %v621_v33 = vld [vmem:[%s1500_s6 + $0x10] sm:$0xff]  ;;  %v622_v34 = vld [vmem:[%s1500_s6 + $0x18] sm:$0xff]  ;;  %v792_v51 = vshrl.u32 %v791_v50, 7  ;;  %s960_s25 = sshll.u32 %s1283_s13, 8  ;;  %p1516_p12 = scmp.ne.s32.totalorder %s1509_s21, 0 }
  0x40   : > { %s1037_s29 = smul.u32 24, %s1380_s27  ;;  %1022 = vmatpush3.bf16.msra.mxu0 %v1021_v6  ;;  %s959_s3 = sshll.u32 %s1380_s27, 4  ;;  %v1026_v31 = vpack.c.bf16 %v620_v27, %v619_v26  ;;  %v1030_v35 = vpack.c.bf16 %v622_v34, %v621_v33  ;;  %v704_v49 = vld [vmem:[%s1515_s18] sm:$0x1] }
  0x41   : > { %1023 = vmatprep.subr.bf16.mxu0 %v1205_v0  ;;  %v788_v52 = vld [vmem:[%s1502_s8] sm:$0x1]  ;;  %v793_v53 = vsub.s32 0, %v792_v51  ;;  %s937_s27 = sshll.u32 %s1367_s17, 4  ;;  %s1209_s13 = smov [#allocation5]  }
  0x42   : > { %s399_s16 = scalar_lea.vmem %s1495_s1, %s1037_s29  ;;  %s394_s23 = scalar_lea.vmem %s1494_s0, %s1037_s29  ;;  %v951_v54 = vld [vmem:[%s1501_s7] ss:$0 sm:$0xff] }
  0x43   : > { %v514_v8 = vld [vmem:[%s399_s16 + $0x10] sm:$0xff]  ;;  %v513_v10 = vld [vmem:[%s399_s16 + $0x8] sm:$0xff]  ;;  %v512_v11 = vld [vmem:[%s399_s16] sm:$0xff]  ;;  %s404_s29 = scalar_lea.vmem %s1496_s2, %s959_s3  ;;  %s389_s26 = scalar_lea.vmem [#allocation5], %s937_s27 }
  0x44   : > { %527 = vperm.xlu0 %1090, %v514_v8   ;;  %522 = vperm.xlu1 %1091, %v513_v10   ;;  %v405_v12 = vld [vmem:[%s394_s23] sm:$0xff]  ;;  %v406_v13 = vld [vmem:[%s394_s23 + $0x8] sm:$0xff]  ;;  %v407_v14 = vld [vmem:[%s394_s23 + $0x10] sm:$0xff]  ;;  %s826_s19 = sshll.u32 %s389_s26, 4  ;;  %s1448_s23 = scalar_lea.hbm %s1503_s9, %s960_s25  ;;  %s1450_s19 = int_to_ptr.vmem [resolvable:$true] %s826_s19 }
  0x45   : > { %1025 = vmatpush3.bf16.msra.mxu0 %v1024_v9  ;;  %v533_v15 = vld [vmem:[%s404_s29] sm:$0xff]  ;;  %v534_v32 = vld [vmem:[%s404_s29 + $0x8] sm:$0xff]  ;;  %s813_s3 = scalar_lea.sflag [#allocation4], %s1367_s17  ;;  %s1136_s18 = scalar_lea.vmem %s1450_s19, 256 }
  0x46   : > { %999 = vmatprep.mubr.msk.f32.mxu1 %vm535_vm2, %v533_v15  ;;  %p1137_p6 = scmp.ne.s32.totalorder %s1450_s19, %s1136_s18  ;;  %s1140_s28 = sshll.u32 %s1209_s13, 4  ;;  %s1141_s28 = int_to_ptr.vmem [resolvable:$false] %s1140_s28 }
  0x47   : > { %s1142_s29 = scalar_lea.vmem %s1141_s28, 512  ;;  %p1143_p10 = scmp.lt.s32.totalorder %s1450_s19, %s1141_s28 }
  0x48   : > { %517 = vperm.xlu0 %1090, %v512_v11   ;;  %989 = vmatmul.mubr.msk.f32.vlgmr.msra.gmra.mrb[0].mxu0 %vm419_vm1, %v405_v12  ;;  %p1138_p13 = pnand %p1137_p6, %p1516_p12  ;;  %p1144_p2 = scmp.lt.s32.totalorder %s1142_s29, %s1136_s18 }
  0x49   : > { %991 = vmatprep.mubr.msk.f32.mxu0 %vm1206_vm0, %v1207_v1 }
  0x4a   : > { %p1139_p7 = pneg %p1138_p13  ;;  %p1145_p4 = por %p1144_p2, %p1143_p10 }
  0x4c   : > { %992 = vmatmul.mubr.msk.f32.gmra.mrb[2].mxu0 %vm419_vm1, %v406_v13  ;;  %p1146_p5 = pnand %p1145_p4, %p1139_p7 }
  0x4d   : > { %994 = vmatprep.mubr.msk.f32.mxu0 %vm1206_vm0, %v1207_v1 }
  0x50   : > { %995 = vmatmul.mubr.msk.f32.gmra.mrb[4].mxu0 %vm419_vm1, %v407_v14 }
  0xc3   : > { %v528_v29 = vpop.permute.xlu0 %527  ;;  %v523_v37 = vpop.permute.xlu1 %522 }
  0xc7   : > { %v518_v39 = vpop.permute.xlu0 %517 }
 0x11b   : > { %v495_v17 = vpop.f32.mrb[0].mxu0 }
 0x11c   : > { %v496_v18 = vadd.f32 %v942_v16, %v495_v17  ;;  %v990_v19 = vpop.f32.mrb[1].mxu0 }
 0x11f   : > { %v500_v20 = vpop.f32.mrb[2].mxu0 }
 0x120   : > { %v501_v21 = vadd.f32 %v942_v16, %v500_v20  ;;  %v993_v22 = vpop.f32.mrb[3].mxu0 }
 0x123   : > { %v505_v23 = vpop.f32.mrb[4].mxu0 }
 0x124   : > { %v506_v24 = vadd.f32 %v942_v16, %v505_v23  ;;  %v996_v25 = vpop.f32.mrb[5].mxu0 }
 0x126   : > { %1092 = vtanh.f32 %v506_v24 }
 0x127   : > { %1094 = vtanh.f32 %v501_v21 }
 0x128   : > { %1096 = vtanh.f32 %v496_v18 }
 0x130   : > { %v1093_v28 = vpop.eup %1092 }
 0x131   : > { %v532_v30 = vmul.f32 %v1093_v28, %v528_v29  ;;  %v1095_v36 = vpop.eup %1094 }
 0x132   : > { %v1097_v38 = vpop.eup %1096  ;;  %v531_v40 = vmul.f32 %v1095_v36, %v523_v37 }
 0x133   : > { %997 = vmatprep.subr.mxu1 %v532_v30  ;;  %v530_v41 = vmul.f32 %v1097_v38, %v518_v39 }
 0x134   : > { %998 = vmatpush3.msra.mxu1 %v532_v30 }
 0x135   : > { %1000 = vmatmul.mubr.msk.f32.vlgmr.msra.gmra.mrb[0].mxu1 %vm535_vm2, %v534_v32  ;;  %1027 = vmatprep.subr.bf16.mxu1 %v1026_v31 }
 0x136   : > { %1029 = vmatpush3.bf16.msra.mxu1 %v1026_v31 }
 0x137   : > { %1031 = vmatprep.subr.bf16.mxu1 %v1030_v35 }
 0x13a   : > { %1033 = vmatpush3.bf16.msra.mxu1 %v1030_v35 }
 0x13b   : > { %1034 = vmatprep.subr.bf16.mxu1 %v1205_v0 }
 0x208   : > { %v1001_v42 = vpop.f32.mrb[0].mxu1 }
 0x209   : > { %v618_v43 = vadd.f32 %v1001_v42, %v531_v40  ;;  %v608_v44 = vpop.f32.mrb[1].mxu1 }
 0x20a   : > { %v617_v45 = vadd.f32 %v608_v44, %v530_v41 }
 0x20c   : > { %1010 = vmatprep.mubr.msk.f32.mxu1 %vm419_vm1, %v617_v45 }
 0x20d   : > { %1011 = vmatmul.mubr.msk.f32.vlgmr.msra.gmra.mrb[2].mxu1 %vm419_vm1, %v618_v43 }
 0x20e   : > { %1017 = vmatprep.mubr.msk.f32.mxu1 %vm1206_vm0, %v1207_v1 }
 0x2e0   : > { %v1012_v46 = vpop.f32.mrb[2].mxu1 }
 0x2e1   : > { %v695_v47 = vpop.f32.mrb[3].mxu1  ;;  %v787_v58 = vadd.f32 %v1012_v46, %v951_v54 }
 0x2e2   : > { %v1035_v48 = vpack.c.bf16 %v1012_v46, %v695_v47  ;;  %v786_v59 = vadd.f32 %v951_v54, %v695_v47 }
 0x2e4   : > { %1036 = vmatpush3.bf16.msra.mxu1 %v1035_v48 }
 0x2e7   : > { %1018 = vmatmul.mubr.msk.f32.vlgmr.msra.gmra.mrb[4].mxu1 %vm705_vm3, %v704_v49 }
 0x3ba   : > { %v775_v55 = vpop.f32.mrb[4].mxu1 }
 0x3bb   : > { %v789_v56 = vmul.f32 %v788_v52, %v775_v55  ;;  %v1019_v57 = vpop.f32.mrb[5].mxu1 }
 0x3bd   : > { %v794_v60 = vrot.slane %v789_v56, %v793_v53 }
 0x3bf   : > { %v796_v61 = vadd.f32 %v794_v60, %v786_v59  ;;  %v797_v62 = vadd.f32 %v794_v60, %v787_v58 }
 0x3c1   : > { %v952_v63 = vmul.f32 -1.442695, %v796_v61  ;;  %v953_v0 = vmul.f32 -1.442695, %v797_v62 }
 0x3c3   : > { %1098 = vpow2.f32 %v952_v63 }
 0x3c4   : > { %1100 = vpow2.f32 %v953_v0 }
 0x3cd   : > { %v1099_v1 = vpop.eup %1098 }
 0x3ce   : > { %v1101_v2 = vpop.eup %1100  ;;  %v804_v3 = vadd.f32 1.0, %v1099_v1 }
 0x3cf   : > { %v805_v4 = vadd.f32 1.0, %v1101_v2 }
 0x3d0   : > { %1102 = vrcp.f32 %v804_v3 }
 0x3d1   : > { %1104 = vrcp.f32 %v805_v4 }
 0x3da   : > { %v1103_v5 = vpop.eup %1102 }
 0x3db   : > { %v1105_v6 = vpop.eup %1104  ;;  %810 = vst [vmem:[%s389_s26] sm:$0xff] %v1103_v5 }
 0x3dc   : > { %811 = vst [vmem:[%s389_s26 + $0x8] sm:$0xff] %v1105_v6 }
 0x3dd   : > { %1149 = shalt.err (!%p1146_p5)
}
 0x3de   : > { %s1150_s16 = scalar_lea.hbm %s1448_s23, 256  ;;  %s1154_s25 = scalar_lea.hbm %s1503_s9, 512 }
 0x3df   : > { %p1151_p8 = scmp.ne.s32.totalorder %s1448_s23, %s1150_s16  ;;  %p1155_p1 = scmp.lt.u32.totalorder %s1448_s23, %s1503_s9 }
 0x3e0   : > { %p1156_p3 = scmp.lt.u32.totalorder %s1154_s25, %s1150_s16  ;;  %p1158_p6 = scmp.lt.u32.totalorder %s1150_s16, %s1448_s23 }
 0x3e1   : > { %p1152_p9 = pnand %p1151_p8, %p1516_p12 }
 0x3e2   : > { %p1157_p11 = por %p1156_p3, %p1155_p1 }
 0x3e3   : > { %p1153_p0 = pneg %p1152_p9 }
 0x3e4   : > { %p1159_p13 = por %p1158_p6, %p1157_p11 }
 0x3e6   : > { %p1160_p7 = pnand %p1159_p13, %p1153_p0 }
 0x3e8   : > { %1163 = shalt.err (!%p1160_p7)
}
 0x3e9   : > { %s1210_s14 = smov 128   ;;  %s1211_s18 = smov 8  }
 0x3ea   : > { %1040 = dma.vmem_to_hbm [thread:$0]  (%p1516_p12), %s1450_s19, 256, %s1448_s23, %s813_s3, %s1210_s14, %s1210_s14, %s1211_s18  }
 0x3eb PF: > { %s841_s13 = sand.u32 1, %s1190_s30   ;;  %p1517_p10 = scmp.ne.s32.totalorder %s1510_s22, 0 }
 0x3ec   : > { %p1518_p2 = scmp.ge.s32.totalorder %s1202_s12, 2  ;;  %s842_s28 = scalar_lea.sflag [#allocation4], %s841_s13 }
 0x3ee   : > { %p1047_p4 = pnand %p1518_p2, %p1517_p10 }
 0x3f0   : > { %1185 = dma.done.wait (!%p1047_p4), %s842_s28, 256  }
 0x3f1   : > { %1187 = vsyncadd (!%p1047_p4), %s842_s28, 4294967040  ;;  %s1519_s29 = sld [smem:[#allocation8_spill]]  ;;  %p22_p5 = scmp.ge.s32.totalorder %s1287_s15, 4  }
 0x3f2   : > { %s1520_s30 = smov %s1194_s10  ;;  %s1521_s10 = smov %s1198_s11 }
 0x3f3   : > { %s1523_s12 = smov %s1287_s15  ;;  %24 = sbr.rel (!%p22_p5) target bundleno = 7 (0x7), region = 110 }
 0x3f7   : > { %s1522_s11 = smov %s1519_s29 }
 0x3fa   :  { %847 = vsyncpa [#allocation3], 1 }
 0x3fb   :  { %849 = vsyncpa [#allocation3 + $0x1], 1 }
 0x3fc   :  { %850 = vsyncpa [#allocation4], 1 }
 0x3fd   :  { %852 = vsyncpa [#allocation4 + $0x1], 1 }

</bundles_post_ra>
